<compile_context>
chip_gen: v6e
topology: v6e:2x2x1
jax: 0.10.0
libtpu: 0.0.40
codegen_flags: <defaults>
</compile_context>

<pallas_src>
import jax
import jax.numpy as jnp
from jax.experimental import pallas as pl
from jax.experimental.pallas import tpu as pltpu

DQ, DV, DH = 128, 256, 64   # fixed by the module: W1(256,64), W2(128,64), V(64,1)

# Max rows of `values` per grid step.  bf16 values double-buffer at 2048 rows
# is ~4 MiB (B=2); with f32 ctx writeback + temps the whole pipeline stays
# well under the explicit 32 MiB scoped-VMEM limit on every generation.
MAX_T_TILE = 2048


def _round_up(x, m):
    return (x + m - 1) // m * m


def _attention_kernel(vals_ref, w1_ref, small_ref, vb_ref, ctx_ref, attn_ref):
    vals = vals_ref[...]                             # (B, Tt, DV) bf16
    B, Tt, Dv = vals.shape

    # Single fused MXU matmul over the flattened tile, bf16 operands with f32
    # accumulation.  Tt is padded to a multiple of 16 (or equals full T), so
    # the (B, Tt, DV) -> (B*Tt, DV) flatten is sublane-tile aligned.
    h1 = jnp.dot(vals.reshape(B * Tt, Dv), w1_ref[...],
                 preferred_element_type=jnp.float32)             # (B*Tt, DH) f32

    h2 = small_ref[0:B, :]                           # (B, DH) f32: query@W2 + b2 + b1 (hoisted)
    vw = small_ref[B:B + 1, :]                       # (1, DH) f32: V weight row

    # broadcast over the time axis (query unsqueezed at dim 1) + tanh (EUP, f32)
    h = jnp.tanh(h1.reshape(B, Tt, DH) + h2[:, None, :])         # (B, Tt, DH)

    # V(h): 64 -> 1 projection as a lane reduction (XLU) with keepdims, so Tt
    # stays on sublanes through the weighted sum (no lane<->sublane relayout).
    # vb (SMEM scalar) is added for fidelity even though it cancels under
    # softmax(dim=0).
    score = jnp.sum(h * vw, axis=-1, keepdims=True) + vb_ref[0]  # (B, Tt, 1)

    # softmax over dim 0 (the batch axis -- exactly as the PyTorch code does)
    m = jnp.max(score, axis=0, keepdims=True)
    e = jnp.exp(score - m)
    denom = jnp.sum(e, axis=0, keepdims=True)
    attn = e * pl.reciprocal(denom, approx=True)                 # (B, Tt, 1) f32

    # context_vector = sum over axis 0 of (attention_weights * values), f32
    ctx_ref[...] = jnp.sum(attn * vals.astype(jnp.float32), axis=0)   # (Tt, DV)
    attn_ref[...] = attn                                               # (B, Tt, 1)


def attention_forward(query, values, params):
    B, T, Dv = values.shape
    w1, b1, w2, b2, vw, vb = params

    # Hoist the tiny, T-invariant W2 path out of the kernel; fold both biases
    # into it (b1 broadcasts identically over every (b, t) row).
    h2_full = query.astype(jnp.float32) @ w2 + b2 + b1                    # (B, DH)
    # Pack small per-call params into one VMEM tile: rows 0..B-1 = h2_full,
    # row B = V weight.  V bias rides in SMEM.
    small = jnp.concatenate([h2_full, vw], axis=0).astype(jnp.float32)   # (B+1, DH)
    vb_s = jnp.reshape(vb, (1,)).astype(jnp.float32)

    # bf16 on the big HBM streams; accumulation stays f32 inside the kernel.
    values_bf = values.astype(jnp.bfloat16)
    w1_bf = w1.astype(jnp.bfloat16)

    # --- tiling: pad T so every block is tile-aligned; slice outputs back ---
    if T <= 512:
        # single block; pad to a multiple of 16 (bf16 sublane packing)
        t_tile = _round_up(T, 16)
        T_pad = t_tile
    else:
        # >= 2 grid iterations (v7x megacore shards the "parallel" T axis),
        # lane-aligned tile (multiple of 128), capped at MAX_T_TILE.
        t_tile = min(MAX_T_TILE, _round_up(pl.cdiv(T, 2), 128))
        T_pad = _round_up(T, t_tile)
    if T_pad != T:
        values_bf = jnp.pad(values_bf, ((0, 0), (0, T_pad - T), (0, 0)))
    grid = (T_pad // t_tile,)

    ctx, attn = pl.pallas_call(
        _attention_kernel,
        grid=grid,
        in_specs=[
            pl.BlockSpec((B, t_tile, Dv), lambda t: (0, t, 0)),   # values: tiled over T
            pl.BlockSpec((DV, DH), lambda t: (0, 0)),             # W1: resident across grid
            pl.BlockSpec((B + 1, DH), lambda t: (0, 0)),          # packed h2 + V weight
            pl.BlockSpec(memory_space=pltpu.MemorySpace.SMEM),    # V bias scalar
        ],
        out_specs=(
            pl.BlockSpec((t_tile, Dv), lambda t: (t, 0)),         # context (lane-dense)
            pl.BlockSpec((B, t_tile, 1), lambda t: (0, t, 0)),    # attention weights (tiny)
        ),
        out_shape=(
            jax.ShapeDtypeStruct((T_pad, Dv), jnp.float32),
            jax.ShapeDtypeStruct((B, T_pad, 1), jnp.float32),
        ),
        compiler_params=pltpu.CompilerParams(
            dimension_semantics=("parallel",),
            vmem_limit_bytes=32 << 20),
    )(values_bf, w1_bf, small, vb_s)

    # TODO(synk): if v7x bundle dumps show the EUP (tanh) as the saturating
    # slot after the bf16/tile changes, run tanh on bf16 operands as well.
    return ctx[:T], attn[:, :T, :]


def init_params(key):
    """Deterministic init following nn.Linear's U(-1/sqrt(fan_in), +...)."""
    ks = jax.random.split(key, 6)

    def lin(kw, kb, fan_in, fan_out):
        bound = 1.0 / float(fan_in) ** 0.5
        w = jax.random.uniform(kw, (fan_in, fan_out), jnp.float32, -bound, bound)
        b = jax.random.uniform(kb, (1, fan_out), jnp.float32, -bound, bound)
        return w, b

    w1, b1 = lin(ks[0], ks[1], DV, DH)     # W1: 256 -> 64
    w2, b2 = lin(ks[2], ks[3], DQ, DH)     # W2: 128 -> 64
    vw, vb = lin(ks[4], ks[5], DH, 1)      # V : 64  -> 1
    # V weight stored as a (1, DH) row; V bias as (1, 1)
    return w1, b1, w2, b2, vw.T, vb


def reference(query, values, params):
    """Pure-JAX f32 reference reproducing the PyTorch forward."""
    w1, b1, w2, b2, vw, vb = params
    h = jnp.tanh(values @ w1 + b1 + (query @ w2 + b2)[:, None, :])
    score = h @ vw.T + vb                              # (B, T, 1)
    attn = jax.nn.softmax(score, axis=0)               # softmax over dim 0
    ctx = jnp.sum(attn * values, axis=0)               # (T, DV)
    return ctx, attn


def _check(query, values, params):
    B, T, _ = values.shape
    ctx, attn = attention_forward(query, values, params)
    jax.block_until_ready((ctx, attn))
    ctx_ref, attn_ref = reference(query, values, params)
    assert ctx.shape == (T, DV) and attn.shape == (B, T, 1)
    # bf16 operands + approx reciprocal -> bf16-level tolerances vs f32 ref.
    assert jnp.allclose(ctx, ctx_ref, atol=3e-2, rtol=3e-2)
    assert jnp.allclose(attn, attn_ref, atol=1e-2, rtol=1e-2)


if __name__ == "__main__":
    key = jax.random.PRNGKey(0)
    kq, kv, kp, kq2, kv2 = jax.random.split(key, 5)

    params = init_params(kp)

    # Small shape implied by the module: batch=2, seq=8.
    B, T = 2, 8
    query = jax.random.normal(kq, (B, DQ), jnp.float32)        # (2, 128)
    values = jax.random.normal(kv, (B, T, DV), jnp.float32)    # (2, 8, 256)
    _check(query, values, params)

    # Also exercise the padded multi-block path (T not a multiple of the tile).
    T2 = 640
    query2 = jax.random.normal(kq2, (B, DQ), jnp.float32)
    values2 = jax.random.normal(kv2, (B, T2, DV), jnp.float32)
    _check(query2, values2, params)

    print("KERNEL_OK")
</pallas_src>

<mosaic_0001>
module attributes {stable_mosaic.version = 11 : i64} {
  func.func @_attention_kernel(%arg0: i32, %arg1: memref<2x16x256xbf16, #tpu.memory_space<vmem>>, %arg2: memref<256x64xbf16, #tpu.memory_space<vmem>>, %arg3: memref<3x64xf32, #tpu.memory_space<vmem>>, %arg4: memref<1xf32, #tpu.memory_space<smem>>, %arg5: memref<16x256xf32, #tpu.memory_space<vmem>>, %arg6: memref<2x16x1xf32, #tpu.memory_space<vmem>>) attributes {dimension_semantics = [#tpu.dimension_semantics<parallel>], iteration_bounds = array<i64: 1>, scalar_prefetch = 0 : i64, scratch_operands = 0 : i64, tpu.core_type = #tpu.core_type<tc>, window_params = [{transform_indices = @transform_0, window_bounds = array<i64: 2, 16, 256>}, {pipeline_mode = #tpu.pipeline_mode<synchronous>, transform_indices = @transform_1, window_bounds = array<i64: 256, 64>}, {pipeline_mode = #tpu.pipeline_mode<synchronous>, transform_indices = @transform_2, window_bounds = array<i64: 3, 64>}, {transform_indices = @transform_3, window_bounds = array<i64: 1>}, {transform_indices = @transform_4, window_bounds = array<i64: 16, 256>}, {transform_indices = @transform_5, window_bounds = array<i64: 2, 16, 1>}]} {
    %c0 = arith.constant 0 : index
    %c0_0 = arith.constant 0 : index
    %c0_1 = arith.constant 0 : index
    %0 = vector.load %arg1[%c0, %c0_0, %c0_1] : memref<2x16x256xbf16, #tpu.memory_space<vmem>>, vector<2x16x256xbf16>
    %1 = vector.shape_cast %0 : vector<2x16x256xbf16> to vector<32x256xbf16>
    %c0_2 = arith.constant 0 : index
    %c0_3 = arith.constant 0 : index
    %2 = vector.load %arg2[%c0_2, %c0_3] : memref<256x64xbf16, #tpu.memory_space<vmem>>, vector<256x64xbf16>
    %cst = arith.constant dense<0.000000e+00> : vector<32x64xf32>
    %3 = tpu.matmul %1, %2, %cst {dimension_numbers = #tpu.dot_dimension_numbers<[1], [0], [0], [1], [0, 0, 1, 1], [], []>} : vector<32x256xbf16>, vector<256x64xbf16>, vector<32x64xf32> -> vector<32x64xf32>
    %c0_4 = arith.constant 0 : index
    %c0_5 = arith.constant 0 : index
    %4 = vector.load %arg3[%c0_4, %c0_5] : memref<3x64xf32, #tpu.memory_space<vmem>>, vector<2x64xf32>
    %c2 = arith.constant 2 : index
    %c0_6 = arith.constant 0 : index
    %5 = vector.load %arg3[%c2, %c0_6] : memref<3x64xf32, #tpu.memory_space<vmem>>, vector<1x64xf32>
    %6 = vector.shape_cast %3 : vector<32x64xf32> to vector<2x16x64xf32>
    %7 = vector.shape_cast %4 : vector<2x64xf32> to vector<2x1x64xf32>
    %8 = vector.broadcast %7 : vector<2x1x64xf32> to vector<2x16x64xf32>
    %9 = arith.addf %6, %8 : vector<2x16x64xf32>
    %10 = math.tanh %9 : vector<2x16x64xf32>
    %11 = vector.shape_cast %5 : vector<1x64xf32> to vector<1x1x64xf32>
    %12 = vector.broadcast %11 : vector<1x1x64xf32> to vector<2x16x64xf32>
    %13 = arith.mulf %10, %12 : vector<2x16x64xf32>
    %cst_7 = arith.constant dense<0.000000e+00> : vector<2x16xf32>
    %14 = vector.multi_reduction <add>, %13, %cst_7 [2] : vector<2x16x64xf32> to vector<2x16xf32>
    %15 = vector.shape_cast %14 : vector<2x16xf32> to vector<2x16x1xf32>
    %c0_8 = arith.constant 0 : index
    %16 = memref.load %arg4[%c0_8] : memref<1xf32, #tpu.memory_space<smem>>
    %17 = vector.broadcast %16 : f32 to vector<2x16x1xf32>
    %18 = arith.addf %15, %17 : vector<2x16x1xf32>
    %cst_9 = arith.constant dense<0xFF800000> : vector<16x1xf32>
    %19 = vector.multi_reduction <maximumf>, %18, %cst_9 [0] : vector<2x16x1xf32> to vector<16x1xf32>
    %20 = vector.shape_cast %19 : vector<16x1xf32> to vector<1x16x1xf32>
    %21 = vector.broadcast %20 : vector<1x16x1xf32> to vector<2x16x1xf32>
    %22 = arith.subf %18, %21 : vector<2x16x1xf32>
    %23 = math.exp %22 : vector<2x16x1xf32>
    %cst_10 = arith.constant dense<0.000000e+00> : vector<16x1xf32>
    %24 = vector.multi_reduction <add>, %23, %cst_10 [0] : vector<2x16x1xf32> to vector<16x1xf32>
    %25 = vector.shape_cast %24 : vector<16x1xf32> to vector<1x16x1xf32>
    %26 = tpu.reciprocal %25 {approx = true} : vector<1x16x1xf32> -> vector<1x16x1xf32>
    %27 = vector.broadcast %26 : vector<1x16x1xf32> to vector<2x16x1xf32>
    %28 = arith.mulf %23, %27 : vector<2x16x1xf32>
    %29 = arith.extf %0 : vector<2x16x256xbf16> to vector<2x16x256xf32>
    %30 = vector.broadcast %28 : vector<2x16x1xf32> to vector<2x16x256xf32>
    %31 = arith.mulf %30, %29 : vector<2x16x256xf32>
    %cst_11 = arith.constant dense<0.000000e+00> : vector<16x256xf32>
    %32 = vector.multi_reduction <add>, %31, %cst_11 [0] : vector<2x16x256xf32> to vector<16x256xf32>
    %c0_12 = arith.constant 0 : index
    %c0_13 = arith.constant 0 : index
    %33 = vector.load %arg5[%c0_12, %c0_13] : memref<16x256xf32, #tpu.memory_space<vmem>>, vector<16x256xf32>
    tpu.vector_store %arg5[%c0_12, %c0_13], %32 {strides = array<i32>} : memref<16x256xf32, #tpu.memory_space<vmem>>, vector<16x256xf32>,
    %c0_14 = arith.constant 0 : index
    %c0_15 = arith.constant 0 : index
    %c0_16 = arith.constant 0 : index
    %34 = vector.load %arg6[%c0_14, %c0_15, %c0_16] : memref<2x16x1xf32, #tpu.memory_space<vmem>>, vector<2x16x1xf32>
    tpu.vector_store %arg6[%c0_14, %c0_15, %c0_16], %28 {strides = array<i32>} : memref<2x16x1xf32, #tpu.memory_space<vmem>>, vector<2x16x1xf32>,
    return
  }
  func.func @transform_0(%arg0: i32) -> (i32, i32, i32) {
    %c0_i32 = arith.constant 0 : i32
    %c0_i32_0 = arith.constant 0 : i32
    %c0_i32_1 = arith.constant 0 : i32
    return %c0_i32, %arg0, %c0_i32_0 : i32, i32, i32
  }
  func.func @transform_1(%arg0: i32) -> (i32, i32) {
    %c0_i32 = arith.constant 0 : i32
    %c0_i32_0 = arith.constant 0 : i32
    %c0_i32_1 = arith.constant 0 : i32
    return %c0_i32, %c0_i32_0 : i32, i32
  }
  func.func @transform_2(%arg0: i32) -> (i32, i32) {
    %c0_i32 = arith.constant 0 : i32
    %c0_i32_0 = arith.constant 0 : i32
    %c0_i32_1 = arith.constant 0 : i32
    return %c0_i32, %c0_i32_0 : i32, i32
  }
  func.func @transform_3(%arg0: i32) -> i32 {
    %c0_i32 = arith.constant 0 : i32
    %c0_i32_0 = arith.constant 0 : i32
    return %c0_i32 : i32
  }
  func.func @transform_4(%arg0: i32) -> (i32, i32) {
    %c0_i32 = arith.constant 0 : i32
    %c0_i32_0 = arith.constant 0 : i32
    return %arg0, %c0_i32 : i32, i32
  }
  func.func @transform_5(%arg0: i32) -> (i32, i32, i32) {
    %c0_i32 = arith.constant 0 : i32
    %c0_i32_0 = arith.constant 0 : i32
    %c0_i32_1 = arith.constant 0 : i32
    return %c0_i32, %arg0, %c0_i32_0 : i32, i32, i32
  }
}

</mosaic_0001>

<bundles_post_ra>
// kernel: tpu_custom_call.1
= control target key start
LH: loop header
LB: loop body
LE: loop exit
PB: predicated region body
PF: predicated region fallthrough
CT: control target
= control target key end

     0   :  { %s642_s0 = inlined_call_operand.vmem [shape: bf16[2,16,256], index: 0, kind: input, shape index: {}]   ;;  %s643_s1 = inlined_call_operand.vmem [shape: bf16[256,64], index: 1, kind: input, shape index: {}]   ;;  %s644_s2 = inlined_call_operand.vmem [shape: f32[3,64], index: 2, kind: input, shape index: {}]   ;;  %s645_s3 = inlined_call_operand.<no memory space> [shape: f32[1], index: 3, kind: input, shape index: {}]   ;;  %s646_s4 = inlined_call_operand.hbm [shape: f32[16,256], index: 4, kind: output, shape index: {0}]   ;;  %s647_s5 = inlined_call_operand.vmem [shape: f32[2,16,1], index: 5, kind: output, shape index: {1}]  }
   0x1   :  { %v434_v0 = vld [vmem:[%s643_s1 + $0x78] sm:$0xff]   ;;  %v436_v2 = vld [vmem:[%s643_s1 + $0x70] sm:$0xff]   ;;  %v438_v4 = vld [vmem:[%s643_s1 + $0x68] sm:$0xff]  }
   0x2   :  { %v435_v1 = vld [vmem:[%s643_s1 + $0x38] sm:$0xff]   ;;  %386 = vmatprep.subr.bf16.mxu0 %v434_v0  ;;  %414 = vmatprep.subr.bf16.mxu1 %v434_v0  ;;  %v437_v3 = vld [vmem:[%s643_s1 + $0x30] sm:$0xff]   ;;  %v439_v5 = vld [vmem:[%s643_s1 + $0x28] sm:$0xff]  }
   0x3   :  { %387 = vmatpush3.bf16.msra.mxu0 %v435_v1  ;;  %422 = vmatpush3.bf16.msra.mxu1 %v435_v1  ;;  %v440_v6 = vld [vmem:[%s643_s1 + $0x60] sm:$0xff]   ;;  %v442_v8 = vld [vmem:[%s643_s1 + $0x58] sm:$0xff]   ;;  %v444_v10 = vld [vmem:[%s643_s1 + $0x50] sm:$0xff]  }
   0x4   :  { %388 = vmatprep.subr.bf16.mxu0 %v436_v2  ;;  %415 = vmatprep.subr.bf16.mxu1 %v436_v2  ;;  %v441_v7 = vld [vmem:[%s643_s1 + $0x20] sm:$0xff]   ;;  %v443_v9 = vld [vmem:[%s643_s1 + $0x18] sm:$0xff]   ;;  %v571_v12 = vld [vmem:[%s642_s0 + $0x8] sm:$0xff] }
   0x5   :  { %v566_v11 = vld [vmem:[%s642_s0] sm:$0xff]  ;;  %v576_v13 = vld [vmem:[%s642_s0 + $0x10] sm:$0xff]  ;;  %v583_v15 = vld [vmem:[%s642_s0 + $0x18] sm:$0xff] }
   0x6   :  { %v365_v14 = vcombine.high %v566_v11, %v571_v12 }
   0x7   :  { %389 = vmatpush3.bf16.msra.mxu0 %v437_v3  ;;  %423 = vmatpush3.bf16.msra.mxu1 %v437_v3 }
   0x8   :  { %390 = vmatprep.subr.bf16.mxu0 %v438_v4  ;;  %416 = vmatprep.subr.bf16.mxu1 %v438_v4 }
   0xb   :  { %391 = vmatpush3.bf16.msra.mxu0 %v439_v5  ;;  %424 = vmatpush3.bf16.msra.mxu1 %v439_v5 }
   0xc   :  { %392 = vmatprep.subr.bf16.mxu0 %v440_v6  ;;  %417 = vmatprep.subr.bf16.mxu1 %v440_v6 }
   0xf   :  { %393 = vmatpush3.bf16.msra.mxu0 %v441_v7  ;;  %425 = vmatpush3.bf16.msra.mxu1 %v441_v7 }
  0x10   :  { %394 = vmatprep.subr.bf16.mxu0 %v442_v8  ;;  %418 = vmatprep.subr.bf16.mxu1 %v442_v8 }
  0x11   :  { %12 = vsyncpa [#allocation4], 0  ;;  %v367_v16 = vcombine.high %v576_v13, %v583_v15  ;;  %v445_v17 = vld [vmem:[%s643_s1 + $0x10] sm:$0xff]   ;;  %v446_v18 = vld [vmem:[%s643_s1 + $0x48] sm:$0xff]   ;;  %206 = vmatprep.mubr.bf16.mxu0 %v365_v14  ;;  %v364_v22 = vcombine.low %v566_v11, %v571_v12  ;;  %v366_v23 = vcombine.low %v576_v13, %v583_v15  ;;  %v496_v24 = vmov 1966171168  }
  0x12   :  { %v447_v19 = vld [vmem:[%s643_s1 + $0x8] sm:$0xff]   ;;  %v448_v20 = vld [vmem:[%s643_s1 + $0x40] sm:$0xff]   ;;  %v235_v25 = vunpack.c.l.s4 %v496_v24  ;;  %v237_v26 = vlaneseq  ;;  %vm274_vm0 = vcmask 523264   ;;  %v288_v2 = vstv %s645_s3  ;;  %s497_s14 = smov [#allocation3]  }
  0x13   :  { %395 = vmatpush3.bf16.msra.mxu0 %v443_v9  ;;  %426 = vmatpush3.bf16.msra.mxu1 %v443_v9  ;;  %v449_v21 = vld [vmem:[%s643_s1] sm:$0xff]   ;;  %vm339_vm1 = vcmask 7168   ;;  %s349_s15 = sshll.u32 %s497_s14, 4  ;;  %s350_s15 = int_to_ptr.vmem [resolvable:$true] %s349_s15 }
  0x14   :  { %396 = vmatprep.subr.bf16.mxu0 %v444_v10  ;;  %419 = vmatprep.subr.bf16.mxu1 %v444_v10  ;;  %v236_v27 = vunpack.c.0.s8 %v235_v25  ;;  %v238_v28 = vshrl.u32 %v237_v26, 7  ;;  %v384_v29 = vld.sshfl [vmem:[%s644_s2] sm:$0x11 pattern:$0x75316420]  ;;  %s474_s20 = scalar_lea.vmem %s350_s15, 512  ;;  %p479_p1 = scmp.lt.s32.totalorder %s350_s15, %s350_s15 }
  0x15   :  { %214 = vmatprep.mubr.bf16.mxu1 %v367_v16  ;;  %v233_v31 = vcombine.high %v384_v29, %v384_v29  ;;  %v385_v53 = vld [vmem:[%s644_s2 + $0x2] ss:$0 sm:$0xff]  ;;  %p475_p0 = scmp.ne.s32.totalorder %s350_s15, %s474_s20  ;;  %p480_p2 = scmp.lt.s32.totalorder %s474_s20, %s474_s20 }
  0x16   :  { %v239_v30 = vsub.s32 %v236_v27, %v238_v28  ;;  %v250_v33 = vsub.s32 0, %v238_v28 }
  0x17   :  { %397 = vmatpush3.bf16.msra.mxu0 %v445_v17  ;;  %427 = vmatpush3.bf16.msra.mxu1 %v445_v17  ;;  %p481_p3 = por %p480_p2, %p479_p1 }
  0x18   :  { %398 = vmatprep.subr.bf16.mxu0 %v446_v18  ;;  %420 = vmatprep.subr.bf16.mxu1 %v446_v18  ;;  %v240_v32 = vrot.slane %v384_v29, %v239_v30  ;;  %v247_v34 = vrot.slane %v233_v31, %v239_v30  ;;  %v315_v31 = vunpack.c.l.bf16 %v566_v11 }
  0x19   :  { %p482_p4 = pnand %p481_p3, %p475_p0 }
  0x1a   :  { %v251_v37 = vrot.slane %v240_v32, %v250_v33  ;;  %v255_v38 = vrot.slane %v247_v34, %v250_v33  ;;  %v316_v32 = vunpack.c.h.bf16 %v566_v11  ;;  %v319_v33 = vunpack.c.l.bf16 %v576_v13 }
  0x1b   :  { %399 = vmatpush3.bf16.msra.mxu0 %v447_v19  ;;  %428 = vmatpush3.bf16.msra.mxu1 %v447_v19  ;;  %v320_v34 = vunpack.c.h.bf16 %v576_v13 }
  0x1c   :  { %400 = vmatprep.subr.bf16.mxu0 %v448_v20  ;;  %421 = vmatprep.subr.bf16.mxu1 %v448_v20 }
  0x1f   :  { %401 = vmatpush3.bf16.msra.mxu0 %v449_v21  ;;  %429 = vmatpush3.bf16.msra.mxu1 %v449_v21 }
  0x22   :  { %207 = vmatmul.mubr.bf16.vlgmr.msra.gmra.mxu0 %v364_v22  ;;  %215 = vmatmul.mubr.bf16.vlgmr.msra.gmra.mxu1 %v366_v23 }
  0xe2   :  { %v402_v35 = vpop.f32.mrf.mxu0  ;;  %v408_v36 = vpop.f32.mrf.mxu1 }
  0xe4   :  { %v403_v39 = vpop.f32.mrf.mxu0  ;;  %v409_v40 = vpop.f32.mrf.mxu1 }
  0xe5   :  { %v404_v41 = vadd.f32 %v403_v39, %v402_v35  ;;  %v410_v42 = vadd.f32 %v409_v40, %v408_v36  ;;  %v318_v39 = vunpack.c.h.bf16 %v571_v12  ;;  %v321_v40 = vunpack.c.l.bf16 %v583_v15 }
  0xe6   :  { %v405_v43 = vpop.f32.mrf.mxu0  ;;  %v411_v44 = vpop.f32.mrf.mxu1 }
  0xe7   :  { %v258_v45 = vadd.f32 %v404_v41, %v251_v37  ;;  %v260_v46 = vadd.f32 %v410_v42, %v255_v38  ;;  %v322_v41 = vunpack.c.h.bf16 %v583_v15 }
  0xe8   :  { %v406_v47 = vpop.f32.mrf.mxu0  ;;  %v412_v48 = vpop.f32.mrf.mxu1 }
  0xe9   :  { %454 = vtanh.f32 %v258_v45  ;;  %v407_v49 = vadd.f32 %v406_v47, %v405_v43  ;;  %v413_v50 = vadd.f32 %v412_v48, %v411_v44 }
  0xea   :  { %456 = vtanh.f32 %v260_v46 }
  0xeb   :  { %v259_v51 = vadd.f32 %v407_v49, %v251_v37  ;;  %v261_v52 = vadd.f32 %v413_v50, %v255_v38  ;;  %v317_v38 = vunpack.c.l.bf16 %v571_v12 }
  0xed   :  { %458 = vtanh.f32 %v259_v51 }
  0xee   :  { %460 = vtanh.f32 %v261_v52 }
  0xf6   :  { %v455_v54 = vpop.eup %454 }
  0xf7   :  { %v457_v55 = vpop.eup %456  ;;  %v270_v56 = vmul.f32 %v455_v54, %v385_v53 }
  0xf8   :  { %v272_v57 = vmul.f32 %v457_v55, %v385_v53 }
  0xf9   :  { %v275_v58 = vsel %vm274_vm0, %v270_v56, 0.0 }
  0xfa   :  { %v459_v59 = vpop.eup %458  ;;  %v281_v60 = vsel %vm274_vm0, %v272_v57, 0.0  ;;  %276 = vadd.xlane.f32.xlu0 %v275_v58 }
  0xfb   :  { %v461_v61 = vpop.eup %460  ;;  %282 = vadd.xlane.f32.xlu1 %v281_v60  ;;  %v271_v62 = vmul.f32 %v459_v59, %v385_v53 }
  0xfc   :  { %v273_v63 = vmul.f32 %v461_v61, %v385_v53 }
  0xfd   :  { %v278_v0 = vsel %vm274_vm0, %v271_v62, 0.0 }
  0xfe   :  { %v284_v1 = vsel %vm274_vm0, %v273_v63, 0.0  ;;  %279 = vadd.xlane.f32.xlu0 %v278_v0 }
  0xff   :  { %285 = vadd.xlane.f32.xlu1 %v284_v1 }
 0x183   :  { %v277_v3 = vpop.xlane.xlu0 %276 }
 0x184   :  { %v283_v4 = vpop.xlane.xlu1 %282  ;;  %v289_v5 = vadd.f32 %v288_v2, %v277_v3 }
 0x185   :  { %v291_v6 = vadd.f32 %v288_v2, %v283_v4 }
 0x187   :  { %v293_v7 = vmax.f32 %v289_v5, %v291_v6  ;;  %v280_v8 = vpop.xlane.xlu0 %279 }
 0x188   :  { %v286_v9 = vpop.xlane.xlu1 %285  ;;  %v290_v10 = vadd.f32 %v288_v2, %v280_v8 }
 0x189   :  { %v295_v14 = vsub.f32 %v289_v5, %v293_v7  ;;  %v297_v16 = vsub.f32 %v291_v6, %v293_v7  ;;  %v292_v17 = vadd.f32 %v288_v2, %v286_v9 }
 0x18b   :  { %v299_v18 = vmul.f32 1.442695, %v295_v14  ;;  %v303_v19 = vmul.f32 1.442695, %v297_v16  ;;  %v294_v20 = vmax.f32 %v290_v10, %v292_v17 }
 0x18d   :  { %462 = vpow2.f32 %v299_v18  ;;  %v296_v21 = vsub.f32 %v290_v10, %v294_v20  ;;  %v298_v22 = vsub.f32 %v292_v17, %v294_v20 }
 0x18e   :  { %464 = vpow2.f32 %v303_v19 }
 0x18f   :  { %v301_v23 = vmul.f32 1.442695, %v296_v21  ;;  %v305_v24 = vmul.f32 1.442695, %v298_v22 }
 0x191   :  { %466 = vpow2.f32 %v301_v23 }
 0x192   :  { %468 = vpow2.f32 %v305_v24 }
 0x19a   :  { %v463_v25 = vpop.eup %462 }
 0x19b   :  { %v465_v26 = vpop.eup %464 }
 0x19c   :  { %v307_v27 = vadd.f32 %v465_v26, %v463_v25 }
 0x19e   :  { %v467_v28 = vpop.eup %466  ;;  %470 = vrcp.f32 %v307_v27 }
 0x19f   :  { %v469_v29 = vpop.eup %468 }
 0x1a0   :  { %v308_v30 = vadd.f32 %v469_v29, %v467_v28 }
 0x1a2   :  { %472 = vrcp.f32 %v308_v30 }
 0x1ab   :  { %v471_v35 = vpop.eup %470 }
 0x1ac   :  { %v311_v36 = vmul.f32 %v471_v35, %v463_v25  ;;  %v313_v37 = vmul.f32 %v471_v35, %v465_v26 }
 0x1ae   :  { %340 = vst.msk [vmem:[%s647_s5] sm:$0xff] %vm339_vm1, %v311_v36  ;;  %342 = vst.msk [vmem:[%s647_s5 + $0x10] sm:$0xff] %vm339_vm1, %v313_v37  ;;  %v323_v11 = vmul.f32 %v315_v31, %v311_v36  ;;  %v324_v13 = vmul.f32 %v316_v32, %v311_v36  ;;  %v327_v42 = vmul.f32 %v319_v33, %v313_v37 }
 0x1af   :  { %v328_v43 = vmul.f32 %v320_v34, %v313_v37  ;;  %v473_v44 = vpop.eup %472 }
 0x1b0   :  { %v312_v12 = vmul.f32 %v473_v44, %v467_v28  ;;  %v314_v45 = vmul.f32 %v473_v44, %v469_v29  ;;  %v331_v46 = vadd.f32 %v327_v42, %v323_v11 }
 0x1b1   :  { %v332_v47 = vadd.f32 %v328_v43, %v324_v13 }
 0x1b2   :  { %341 = vst.msk [vmem:[%s647_s5 + $0x8] sm:$0xff] %vm339_vm1, %v312_v12  ;;  %343 = vst.msk [vmem:[%s647_s5 + $0x18] sm:$0xff] %vm339_vm1, %v314_v45  ;;  %v325_v15 = vmul.f32 %v317_v38, %v312_v12  ;;  %v326_v48 = vmul.f32 %v318_v39, %v312_v12  ;;  %v329_v49 = vmul.f32 %v321_v40, %v314_v45 }
 0x1b3   :  { %v330_v50 = vmul.f32 %v322_v41, %v314_v45  ;;  %335 = vst [vmem:[#allocation3] sm:$0xff] %v331_v46  ;;  %336 = vst [vmem:[#allocation3 + $0x8] sm:$0xff] %v332_v47 }
 0x1b4   :  { %v333_v51 = vadd.f32 %v329_v49, %v325_v15 }
 0x1b5   :  { %v334_v52 = vadd.f32 %v330_v50, %v326_v48 }
 0x1b6   :  { %337 = vst [vmem:[#allocation3 + $0x10] sm:$0xff] %v333_v51 }
 0x1b7   :  { %338 = vst [vmem:[#allocation3 + $0x18] sm:$0xff] %v334_v52 }
 0x1b8   :  { %485 = shalt.err (!%p482_p4)
}
 0x1b9   :  { %s498_s21 = smov 256   ;;  %s499_s5 = smov 16  }
 0x1ba   :  { %355 = dma.vmem_to_hbm [thread:$0]  %s350_s15, 512, %s646_s4, [#allocation4], %s498_s21, %s498_s21, %s499_s5  }
 0x1bb   :  { %494 = dma.done.wait [#allocation4], 512  }
 0x1bc   :  { %495 = vsyncadd [#allocation4], 4294966784 }
 0x1bd   :  { %363 = vsyncpa [#allocation4], 1 }

</bundles_post_ra>
